<compile_context>
chip_gen: v6e
topology: v6e:2x2x1
jax: 0.10.0
libtpu: 0.0.40
codegen_flags: <defaults>
</compile_context>

<pallas_src>
import functools

import numpy as np
import jax
import jax.numpy as jnp
from jax.experimental import pallas as pl
from jax.experimental.pallas import tpu as pltpu

# ----------------------------- config ---------------------------------------
INPUT_SR = 24000
SLM_SR = 16000
LOWPASS_WIDTH = 6        # torchaudio Resample default
ROLLOFF = 0.99           # torchaudio Resample default

HIDDEN = 32              # synthetic WavLM hidden size
KERNEL = 10              # synthetic feature-extractor conv kernel
STRIDE = 5               # synthetic feature-extractor conv stride
NUM_LAYERS = 2           # synthetic encoder layers -> 3 hidden states

LANE = 128
SUBLANE = 8
TM = 16                  # frame rows per branch per grid step (use 256-512 at scale)


def _round_up(x, m):
    return (x + m - 1) // m * m


# ------------------- polyphase resample kernel (torchaudio-style) -----------
def polyphase_resample_kernel(orig_sr, new_sr):
    """Small (ntaps, new) Hann-windowed-sinc polyphase kernel.

    Mirrors torchaudio.transforms.Resample (sinc_interp_hann) for the reduced
    ratio orig/new:  y16[k*new + i] = sum_j y_pad[k*orig + j] * K[j, i], with
    y_pad zero-padded by `width` on the left.
    """
    g = int(np.gcd(orig_sr, new_sr))
    orig, new = orig_sr // g, new_sr // g
    base = min(orig, new) * ROLLOFF
    width = int(np.ceil(LOWPASS_WIDTH * orig / base))
    ntaps = 2 * width + orig
    scale = base / orig

    K = np.zeros((ntaps, new), np.float64)
    for i in range(new):
        for j in range(ntaps):
            t = (-i / new + (j - width) / orig) * base
            t = float(np.clip(t, -LOWPASS_WIDTH, LOWPASS_WIDTH))
            window = np.cos(t * np.pi / LOWPASS_WIDTH / 2.0) ** 2
            sinc = 1.0 if t == 0.0 else np.sin(t * np.pi) / (t * np.pi)
            K[j, i] = sinc * window * scale
    return K, orig, new, width


def compose_resample_into_feature(Kpoly, orig, new, width, w_feat_np):
    """Fold resample + strided-conv im2col into one per-class linear map.

    A 16 kHz conv frame f reads KERNEL consecutive resampled samples, each a
    ntaps-dot over raw 24 kHz audio.  The composed map (raw window of win_len
    samples) -> (conv frame) depends only on the phase class r = (f*STRIDE)%new,
    so we build one (win_len, HIDDEN) matrix per class: Wc[r] = P_r @ W_feat.
    """
    ntaps = Kpoly.shape[0]
    win_len = ((new - 1 + KERNEL - 1) // new) * orig + ntaps
    Wc = np.zeros((new, win_len, HIDDEN), np.float64)
    for r in range(new):
        P = np.zeros((win_len, KERNEL), np.float64)
        for kc in range(KERNEL):
            db, ph = divmod(r + kc, new)          # block offset, resample phase
            P[db * orig: db * orig + ntaps, kc] = Kpoly[:, ph]
        Wc[r] = P @ w_feat_np
    return Wc, win_len


# --------------------------- synthetic WavLM params --------------------------
def init_wavlm_params(key):
    k1, k2, k3 = jax.random.split(key, 3)
    return {
        "w_feat": 0.1 * jax.random.normal(k1, (KERNEL, HIDDEN), jnp.float32),
        "b_feat": jnp.zeros((HIDDEN,), jnp.float32),
        "w": 0.1 * jax.random.normal(k2, (NUM_LAYERS, HIDDEN, HIDDEN), jnp.float32),
        "b": 0.01 * jax.random.normal(k3, (NUM_LAYERS, HIDDEN), jnp.float32),
    }


def pack_params(params, Kpoly, orig, new, width):
    """Compose resample into the feature weight, pad lane/K axes to 128, and
    emit bf16 matmul weights (biases stay f32: they are added after the f32
    MXU accumulation).  Padded hidden channels stay exactly 0 through GELU and
    the residual, so they never affect the loss."""
    w_feat_np = np.asarray(params["w_feat"], np.float64)
    Wc, win_len = compose_resample_into_feature(Kpoly, orig, new, width, w_feat_np)

    k_pad = _round_up(win_len, LANE)
    h_pad = _round_up(HIDDEN, LANE)

    wf = np.zeros((new, k_pad, h_pad), np.float32)
    wf[:, :win_len, :HIDDEN] = Wc
    bf = np.zeros((1, h_pad), np.float32)
    bf[0, :HIDDEN] = np.asarray(params["b_feat"])
    wl = np.zeros((NUM_LAYERS, h_pad, h_pad), np.float32)
    wl[:, :HIDDEN, :HIDDEN] = np.asarray(params["w"])
    bl = np.zeros((NUM_LAYERS, 1, h_pad), np.float32)
    bl[:, 0, :HIDDEN] = np.asarray(params["b"])

    return dict(wf=jnp.asarray(wf, jnp.bfloat16), bf=jnp.asarray(bf),
                wl=jnp.asarray(wl, jnp.bfloat16), bl=jnp.asarray(bl),
                win_len=win_len)


# ----------------------------- fused Pallas kernel ---------------------------
def _gelu(x):
    # TODO(synk): HF WavLM uses exact (erf) GELU; the tanh approximation is used
    # for the synthetic stand-in (EUP transcendental, co-issues under the MXU).
    return jax.nn.gelu(x, approximate=True)


def _wavlm_loss_kernel(x_ref, wf_ref, bf_ref, wl_ref, bl_ref, o_ref, *,
                       num_layers, tm):
    """One grid step = one (phase class, frame tile).

    x block = [tm real rows ; tm generated rows] so every layer is ONE bf16
    matmul serving both branches.  Per-layer L1 partials are reduced only along
    the sublane-group axis (pure VPU vreg adds) into the resident (8, 128) f32
    output block; the final cross-lane reduction happens in the wrapper.
    """
    i = pl.program_id(1)                  # frame-tile (reduction) axis

    @pl.when(i == 0)
    def _init():
        o_ref[...] = jnp.zeros_like(o_ref)

    x = x_ref[...]                        # (2*tm, Kp) bf16
    wf = wf_ref[...]                      # (Kp, Hp)  bf16, this phase class
    bf = bf_ref[...]                      # (1, Hp)   f32
    h = _gelu(jnp.dot(x, wf, preferred_element_type=jnp.float32) + bf)  # f32

    def l1_partial(h):
        d = jnp.abs(h[:tm] - h[tm:])                          # (tm, Hp) f32
        # reduce only across vreg-aligned sublane groups -> VPU adds, no XLU.
        return jnp.sum(d.reshape(tm // SUBLANE, SUBLANE, d.shape[-1]), axis=0)

    acc = l1_partial(h)
    for l in range(num_layers):           # static unroll, NUM_LAYERS is tiny
        w = wl_ref[l]                     # (Hp, Hp) bf16 (resident in VMEM)
        b = bl_ref[l]                     # (1, Hp)  f32
        h = _gelu(jnp.dot(h.astype(jnp.bfloat16), w,
                          preferred_element_type=jnp.float32) + b) + h
        acc = acc + l1_partial(h)

    o_ref[...] += acc                     # resident accumulator block


def wavlm_loss(y_hat, y, wf, bf, wl, bl, *, win_len, orig, new, width, tm=TM):
    """Pallas equivalent of WavLMLoss.forward(y_hat, y)."""
    B, t_in = y.shape
    t16 = -(-(t_in * new) // orig)                      # ceil(t_in*new/orig)
    num_frames = (t16 - KERNEL) // STRIDE + 1
    k_pad, h_pad = wf.shape[1], wf.shape[2]
    assert tm % SUBLANE == 0 and (2 * tm) % 16 == 0     # bf16 sublane packing

    # group conv frames by resample phase class (same class -> same composed
    # weight); the loss is a mean over rows, so reordering frames is free.
    f_all = np.arange(num_frames)
    classes = [f_all[(f_all * STRIDE) % new == c] for c in range(new)]
    mc_pad = _round_up(max(max(B * len(fc) for fc in classes), tm), tm)
    n_tiles = mc_pad // tm

    def branch_windows(x, fc):
        # strided im2col over the RAW padded audio — no one-hot zero-stuffing;
        # each row carries only win_len live samples.  Pure indexing.
        # TODO(synk): at real scale do this in-kernel with pl.ds strided reads.
        starts = (fc * STRIDE // new) * orig            # padded coords
        right = max(0, int(starts.max()) + win_len - (width + t_in))
        x_pad = jnp.pad(x, ((0, 0), (width, right)))
        idx = jnp.asarray(starts[:, None] + np.arange(win_len)[None, :])
        return x_pad[:, idx].reshape(B * len(fc), win_len)

    per_class = []
    for fc in classes:
        # real branch is computed under torch.no_grad() in the original module
        xr_c = jax.lax.stop_gradient(branch_windows(y, fc))
        xg_c = branch_windows(y_hat, fc)

        def pad_cast(z):
            z = jnp.pad(z, ((0, mc_pad - z.shape[0]), (0, k_pad - win_len)))
            return z.astype(jnp.bfloat16)               # bf16 MXU operands

        xr_t = pad_cast(xr_c).reshape(n_tiles, tm, k_pad)
        xg_t = pad_cast(xg_c).reshape(n_tiles, tm, k_pad)
        # tile-interleave real/generated: each kernel block is
        # [tm real rows ; tm generated rows] -> one matmul per layer serves both.
        per_class.append(
            jnp.concatenate([xr_t, xg_t], axis=1).reshape(n_tiles * 2 * tm, k_pad))
    x = jnp.stack(per_class, axis=0)                    # (new, n_tiles*2*tm, Kp)

    # padded rows are identical (zero) in both branches -> contribute exactly 0;
    # padded hidden channels stay exactly 0; divide by the real per-layer numel.
    inv_numel = 1.0 / float(B * num_frames * HIDDEN)

    rows = 2 * tm
    steps = new * n_tiles
    cost = pl.CostEstimate(
        flops=int(steps * (2 * rows * k_pad * h_pad
                           + NUM_LAYERS * 2 * rows * h_pad * h_pad)),
        transcendentals=int(steps * (NUM_LAYERS + 1) * rows * h_pad),
        bytes_accessed=int(x.size * 2 + wf.size * 2 + wl.size * 2
                           + bf.size * 4 + bl.size * 4 + new * SUBLANE * h_pad * 4),
    )

    kern = functools.partial(_wavlm_loss_kernel, num_layers=NUM_LAYERS, tm=tm)
    grid_spec = pltpu.PrefetchScalarGridSpec(
        num_scalar_prefetch=0,
        grid=(new, n_tiles),                            # (phase class, frame tile)
        in_specs=[
            pl.BlockSpec((None, 2 * tm, k_pad), lambda c, i: (c, i, 0)),   # x
            pl.BlockSpec((None, k_pad, h_pad), lambda c, i: (c, 0, 0)),    # wf[c]
            pl.BlockSpec((1, h_pad), lambda c, i: (0, 0)),                 # bf
            pl.BlockSpec((NUM_LAYERS, h_pad, h_pad), lambda c, i: (0, 0, 0)),  # wl
            pl.BlockSpec((NUM_LAYERS, 1, h_pad), lambda c, i: (0, 0, 0)),      # bl
        ],
        # per-class (8,128) partial-sum blocks: the class axis can be "parallel"
        # (distinct output blocks -> both TensorCores on v7x), the frame-tile
        # axis is the accumulation axis.
        out_specs=pl.BlockSpec((None, SUBLANE, h_pad), lambda c, i: (c, 0, 0)),
    )
    out = pl.pallas_call(
        kern,
        out_shape=jax.ShapeDtypeStruct((new, SUBLANE, h_pad), jnp.float32),
        grid_spec=grid_spec,
        compiler_params=pltpu.CompilerParams(
            dimension_semantics=("parallel", "arbitrary"),
            # 32 MiB is plenty here and safe on every chip (v7x physical VMEM
            # is only 64 MiB); raise toward 64-96 MiB on v6e at real scale.
            vmem_limit_bytes=32 * 1024 * 1024),
        cost_estimate=cost,
    )(x, wf, bf, wl, bl)

    # single cross-lane/sublane reduction over 2*8*128 floats.
    return jnp.sum(out) * inv_numel


# ----------------------------- pure numpy reference --------------------------
def _np_gelu(x):
    return 0.5 * x * (1.0 + np.tanh(np.sqrt(2.0 / np.pi) * (x + 0.044715 * x ** 3)))


def reference_loss(y_hat, y, params, Kpoly, orig, new, width):
    """Straightforward (un-fused, un-composed) float64 reference."""
    w_feat = np.asarray(params["w_feat"], np.float64)
    b_feat = np.asarray(params["b_feat"], np.float64)
    w = np.asarray(params["w"], np.float64)
    b = np.asarray(params["b"], np.float64)
    ntaps = Kpoly.shape[0]

    def resample(x):
        x = np.asarray(x, np.float64)
        bsz, t_in = x.shape
        t_out = int(np.ceil(t_in * new / orig))
        out = np.zeros((bsz, t_out), np.float64)
        for n in range(t_out):
            kb, ph = divmod(n, new)
            for j in range(ntaps):
                m = kb * orig + j - width
                if 0 <= m < t_in:
                    out[:, n] += x[:, m] * Kpoly[j, ph]
        return out

    def hidden_states(x16):
        bsz, t16 = x16.shape
        nf = (t16 - KERNEL) // STRIDE + 1
        frames = np.stack([x16[:, f * STRIDE: f * STRIDE + KERNEL]
                           for f in range(nf)], axis=1).reshape(bsz * nf, KERNEL)
        h = _np_gelu(frames @ w_feat + b_feat)
        hs = [h]
        for l in range(NUM_LAYERS):
            h = _np_gelu(h @ w[l] + b[l]) + h
            hs.append(h)
        return hs

    er = hidden_states(resample(np.asarray(y)))        # real
    eg = hidden_states(resample(np.asarray(y_hat)))    # generated
    return float(sum(np.mean(np.abs(a - c)) for a, c in zip(er, eg)))


# --------------------------------- main ---------------------------------------
if __name__ == "__main__":
    key = jax.random.PRNGKey(0)
    k_y, k_yh, k_params = jax.random.split(key, 3)

    B, T_IN = 2, 240                      # 240 samples @ 24 kHz -> 160 @ 16 kHz
    y = jax.random.normal(k_y, (B, T_IN), dtype=jnp.float32)
    y_hat = jax.random.normal(k_yh, (B, T_IN), dtype=jnp.float32)

    # TODO(synk): pretrained microsoft/wavlm-base-plus weights are replaced by a
    # deterministic synthetic stand-in (no checkpoint loading in-kernel).
    params = init_wavlm_params(k_params)
    Kpoly, orig, new, width = polyphase_resample_kernel(INPUT_SR, SLM_SR)
    packed = pack_params(params, Kpoly, orig, new, width)

    loss_fn = jax.jit(functools.partial(
        wavlm_loss, win_len=packed["win_len"], orig=orig, new=new, width=width))
    loss = loss_fn(y_hat, y, packed["wf"], packed["bf"], packed["wl"], packed["bl"])
    jax.block_until_ready(loss)

    ref = reference_loss(y_hat, y, params, Kpoly, orig, new, width)
    # bf16 MXU operands (inputs + weights) cost ~0.5-1% vs the float64 reference.
    np.testing.assert_allclose(float(loss), ref, rtol=3e-2, atol=1e-4)
    assert loss.shape == () and jnp.isfinite(loss)
    print("KERNEL_OK")
</pallas_src>

<mosaic_0001>
module attributes {stable_mosaic.version = 11 : i64} {
  func.func @_wavlm_loss_kernel(%arg0: i32, %arg1: i32, %arg2: memref<1x32x128xbf16, #tpu.memory_space<vmem>>, %arg3: memref<1x128x128xbf16, #tpu.memory_space<vmem>>, %arg4: memref<1x128xf32, #tpu.memory_space<vmem>>, %arg5: memref<2x128x128xbf16, #tpu.memory_space<vmem>>, %arg6: memref<2x1x128xf32, #tpu.memory_space<vmem>>, %arg7: memref<1x8x128xf32, #tpu.memory_space<vmem>>) attributes {dimension_semantics = [#tpu.dimension_semantics<parallel>, #tpu.dimension_semantics<arbitrary>], iteration_bounds = array<i64: 2, 2>, scalar_prefetch = 0 : i64, scratch_operands = 0 : i64, tpu.core_type = #tpu.core_type<tc>, window_params = [{transform_indices = @transform_0, window_bounds = array<i64: 1, 32, 128>}, {transform_indices = @transform_1, window_bounds = array<i64: 1, 128, 128>}, {pipeline_mode = #tpu.pipeline_mode<synchronous>, transform_indices = @transform_2, window_bounds = array<i64: 1, 128>}, {pipeline_mode = #tpu.pipeline_mode<synchronous>, transform_indices = @transform_3, window_bounds = array<i64: 2, 128, 128>}, {pipeline_mode = #tpu.pipeline_mode<synchronous>, transform_indices = @transform_4, window_bounds = array<i64: 2, 1, 128>}, {transform_indices = @transform_5, window_bounds = array<i64: 1, 8, 128>}]} {
    %c0_i32 = arith.constant 0 : i32
    %0 = arith.cmpi eq, %arg1, %c0_i32 : i32
    %1 = arith.extui %0 : i1 to i32
    %c0_i32_0 = arith.constant 0 : i32
    %2 = arith.cmpi ne, %1, %c0_i32_0 : i32
    scf.if %2 {
      %cst_42 = arith.constant 0.000000e+00 : f32
      %94 = vector.broadcast %cst_42 : f32 to vector<8x128xf32>
      %c0_43 = arith.constant 0 : index
      %c0_44 = arith.constant 0 : index
      %c0_45 = arith.constant 0 : index
      %95 = vector.load %arg7[%c0_43, %c0_44, %c0_45] : memref<1x8x128xf32, #tpu.memory_space<vmem>>, vector<1x8x128xf32>
      %96 = vector.shape_cast %95 : vector<1x8x128xf32> to vector<8x128xf32>
      %97 = vector.shape_cast %94 : vector<8x128xf32> to vector<1x8x128xf32>
      tpu.vector_store %arg7[%c0_43, %c0_44, %c0_45], %97 {strides = array<i32>} : memref<1x8x128xf32, #tpu.memory_space<vmem>>, vector<1x8x128xf32>,
    } else {
    }
    %c0 = arith.constant 0 : index
    %c0_1 = arith.constant 0 : index
    %c0_2 = arith.constant 0 : index
    %3 = vector.load %arg2[%c0, %c0_1, %c0_2] : memref<1x32x128xbf16, #tpu.memory_space<vmem>>, vector<1x32x128xbf16>
    %4 = vector.shape_cast %3 : vector<1x32x128xbf16> to vector<32x128xbf16>
    %c0_3 = arith.constant 0 : index
    %c0_4 = arith.constant 0 : index
    %c0_5 = arith.constant 0 : index
    %5 = vector.load %arg3[%c0_3, %c0_4, %c0_5] : memref<1x128x128xbf16, #tpu.memory_space<vmem>>, vector<1x128x128xbf16>
    %6 = vector.shape_cast %5 : vector<1x128x128xbf16> to vector<128x128xbf16>
    %c0_6 = arith.constant 0 : index
    %c0_7 = arith.constant 0 : index
    %7 = vector.load %arg4[%c0_6, %c0_7] : memref<1x128xf32, #tpu.memory_space<vmem>>, vector<1x128xf32>
    %cst = arith.constant dense<0.000000e+00> : vector<32x128xf32>
    %8 = tpu.matmul %4, %6, %cst {dimension_numbers = #tpu.dot_dimension_numbers<[1], [0], [0], [1], [0, 0, 1, 1], [], []>} : vector<32x128xbf16>, vector<128x128xbf16>, vector<32x128xf32> -> vector<32x128xf32>
    %9 = vector.broadcast %7 : vector<1x128xf32> to vector<32x128xf32>
    %10 = arith.addf %8, %9 : vector<32x128xf32>
    %11 = arith.mulf %10, %10 : vector<32x128xf32>
    %12 = arith.mulf %10, %11 : vector<32x128xf32>
    %cst_8 = arith.constant 4.471500e-02 : f32
    %13 = vector.broadcast %cst_8 : f32 to vector<32x128xf32>
    %14 = arith.mulf %13, %12 : vector<32x128xf32>
    %15 = arith.addf %10, %14 : vector<32x128xf32>
    %cst_9 = arith.constant 0.797884583 : f32
    %16 = vector.broadcast %cst_9 : f32 to vector<32x128xf32>
    %17 = arith.mulf %16, %15 : vector<32x128xf32>
    %18 = math.tanh %17 : vector<32x128xf32>
    %cst_10 = arith.constant 1.000000e+00 : f32
    %19 = vector.broadcast %cst_10 : f32 to vector<32x128xf32>
    %20 = arith.addf %19, %18 : vector<32x128xf32>
    %cst_11 = arith.constant 5.000000e-01 : f32
    %21 = vector.broadcast %cst_11 : f32 to vector<32x128xf32>
    %22 = arith.mulf %21, %20 : vector<32x128xf32>
    %23 = arith.mulf %10, %22 : vector<32x128xf32>
    %24 = vector.extract_strided_slice %23 {offsets = [0, 0], sizes = [16, 128], strides = [1, 1]} : vector<32x128xf32> to vector<16x128xf32>
    %25 = vector.extract_strided_slice %23 {offsets = [16, 0], sizes = [16, 128], strides = [1, 1]} : vector<32x128xf32> to vector<16x128xf32>
    %26 = arith.subf %24, %25 : vector<16x128xf32>
    %27 = math.absf %26 : vector<16x128xf32>
    %28 = vector.shape_cast %27 : vector<16x128xf32> to vector<2x8x128xf32>
    %cst_12 = arith.constant dense<0.000000e+00> : vector<8x128xf32>
    %29 = vector.multi_reduction <add>, %28, %cst_12 [0] : vector<2x8x128xf32> to vector<8x128xf32>
    %c0_13 = arith.constant 0 : index
    %c0_14 = arith.constant 0 : index
    %c0_15 = arith.constant 0 : index
    %30 = vector.load %arg5[%c0_13, %c0_14, %c0_15] : memref<2x128x128xbf16, #tpu.memory_space<vmem>>, vector<1x128x128xbf16>
    %31 = vector.shape_cast %30 : vector<1x128x128xbf16> to vector<128x128xbf16>
    %c0_16 = arith.constant 0 : index
    %c0_17 = arith.constant 0 : index
    %c0_18 = arith.constant 0 : index
    %32 = vector.load %arg6[%c0_16, %c0_17, %c0_18] : memref<2x1x128xf32, #tpu.memory_space<vmem>>, vector<1x1x128xf32>
    %33 = vector.shape_cast %32 : vector<1x1x128xf32> to vector<1x128xf32>
    %34 = arith.truncf %23 : vector<32x128xf32> to vector<32x128xbf16>
    %cst_19 = arith.constant dense<0.000000e+00> : vector<32x128xf32>
    %35 = tpu.matmul %34, %31, %cst_19 {dimension_numbers = #tpu.dot_dimension_numbers<[1], [0], [0], [1], [0, 0, 1, 1], [], []>} : vector<32x128xbf16>, vector<128x128xbf16>, vector<32x128xf32> -> vector<32x128xf32>
    %36 = vector.broadcast %33 : vector<1x128xf32> to vector<32x128xf32>
    %37 = arith.addf %35, %36 : vector<32x128xf32>
    %38 = arith.mulf %37, %37 : vector<32x128xf32>
    %39 = arith.mulf %37, %38 : vector<32x128xf32>
    %cst_20 = arith.constant 4.471500e-02 : f32
    %40 = vector.broadcast %cst_20 : f32 to vector<32x128xf32>
    %41 = arith.mulf %40, %39 : vector<32x128xf32>
    %42 = arith.addf %37, %41 : vector<32x128xf32>
    %cst_21 = arith.constant 0.797884583 : f32
    %43 = vector.broadcast %cst_21 : f32 to vector<32x128xf32>
    %44 = arith.mulf %43, %42 : vector<32x128xf32>
    %45 = math.tanh %44 : vector<32x128xf32>
    %cst_22 = arith.constant 1.000000e+00 : f32
    %46 = vector.broadcast %cst_22 : f32 to vector<32x128xf32>
    %47 = arith.addf %46, %45 : vector<32x128xf32>
    %cst_23 = arith.constant 5.000000e-01 : f32
    %48 = vector.broadcast %cst_23 : f32 to vector<32x128xf32>
    %49 = arith.mulf %48, %47 : vector<32x128xf32>
    %50 = arith.mulf %37, %49 : vector<32x128xf32>
    %51 = arith.addf %50, %23 : vector<32x128xf32>
    %52 = vector.extract_strided_slice %51 {offsets = [0, 0], sizes = [16, 128], strides = [1, 1]} : vector<32x128xf32> to vector<16x128xf32>
    %53 = vector.extract_strided_slice %51 {offsets = [16, 0], sizes = [16, 128], strides = [1, 1]} : vector<32x128xf32> to vector<16x128xf32>
    %54 = arith.subf %52, %53 : vector<16x128xf32>
    %55 = math.absf %54 : vector<16x128xf32>
    %56 = vector.shape_cast %55 : vector<16x128xf32> to vector<2x8x128xf32>
    %cst_24 = arith.constant dense<0.000000e+00> : vector<8x128xf32>
    %57 = vector.multi_reduction <add>, %56, %cst_24 [0] : vector<2x8x128xf32> to vector<8x128xf32>
    %58 = arith.addf %29, %57 : vector<8x128xf32>
    %c1 = arith.constant 1 : index
    %c0_25 = arith.constant 0 : index
    %c0_26 = arith.constant 0 : index
    %59 = vector.load %arg5[%c1, %c0_25, %c0_26] : memref<2x128x128xbf16, #tpu.memory_space<vmem>>, vector<1x128x128xbf16>
    %60 = vector.shape_cast %59 : vector<1x128x128xbf16> to vector<128x128xbf16>
    %c1_27 = arith.constant 1 : index
    %c0_28 = arith.constant 0 : index
    %c0_29 = arith.constant 0 : index
    %61 = vector.load %arg6[%c1_27, %c0_28, %c0_29] : memref<2x1x128xf32, #tpu.memory_space<vmem>>, vector<1x1x128xf32>
    %62 = vector.shape_cast %61 : vector<1x1x128xf32> to vector<1x128xf32>
    %63 = arith.truncf %51 : vector<32x128xf32> to vector<32x128xbf16>
    %cst_30 = arith.constant dense<0.000000e+00> : vector<32x128xf32>
    %64 = tpu.matmul %63, %60, %cst_30 {dimension_numbers = #tpu.dot_dimension_numbers<[1], [0], [0], [1], [0, 0, 1, 1], [], []>} : vector<32x128xbf16>, vector<128x128xbf16>, vector<32x128xf32> -> vector<32x128xf32>
    %65 = vector.broadcast %62 : vector<1x128xf32> to vector<32x128xf32>
    %66 = arith.addf %64, %65 : vector<32x128xf32>
    %67 = arith.mulf %66, %66 : vector<32x128xf32>
    %68 = arith.mulf %66, %67 : vector<32x128xf32>
    %cst_31 = arith.constant 4.471500e-02 : f32
    %69 = vector.broadcast %cst_31 : f32 to vector<32x128xf32>
    %70 = arith.mulf %69, %68 : vector<32x128xf32>
    %71 = arith.addf %66, %70 : vector<32x128xf32>
    %cst_32 = arith.constant 0.797884583 : f32
    %72 = vector.broadcast %cst_32 : f32 to vector<32x128xf32>
    %73 = arith.mulf %72, %71 : vector<32x128xf32>
    %74 = math.tanh %73 : vector<32x128xf32>
    %cst_33 = arith.constant 1.000000e+00 : f32
    %75 = vector.broadcast %cst_33 : f32 to vector<32x128xf32>
    %76 = arith.addf %75, %74 : vector<32x128xf32>
    %cst_34 = arith.constant 5.000000e-01 : f32
    %77 = vector.broadcast %cst_34 : f32 to vector<32x128xf32>
    %78 = arith.mulf %77, %76 : vector<32x128xf32>
    %79 = arith.mulf %66, %78 : vector<32x128xf32>
    %80 = arith.addf %79, %51 : vector<32x128xf32>
    %81 = vector.extract_strided_slice %80 {offsets = [0, 0], sizes = [16, 128], strides = [1, 1]} : vector<32x128xf32> to vector<16x128xf32>
    %82 = vector.extract_strided_slice %80 {offsets = [16, 0], sizes = [16, 128], strides = [1, 1]} : vector<32x128xf32> to vector<16x128xf32>
    %83 = arith.subf %81, %82 : vector<16x128xf32>
    %84 = math.absf %83 : vector<16x128xf32>
    %85 = vector.shape_cast %84 : vector<16x128xf32> to vector<2x8x128xf32>
    %cst_35 = arith.constant dense<0.000000e+00> : vector<8x128xf32>
    %86 = vector.multi_reduction <add>, %85, %cst_35 [0] : vector<2x8x128xf32> to vector<8x128xf32>
    %87 = arith.addf %58, %86 : vector<8x128xf32>
    %c0_36 = arith.constant 0 : index
    %c0_37 = arith.constant 0 : index
    %c0_38 = arith.constant 0 : index
    %88 = vector.load %arg7[%c0_36, %c0_37, %c0_38] : memref<1x8x128xf32, #tpu.memory_space<vmem>>, vector<1x8x128xf32>
    %89 = vector.shape_cast %88 : vector<1x8x128xf32> to vector<8x128xf32>
    %90 = arith.addf %89, %87 : vector<8x128xf32>
    %c0_39 = arith.constant 0 : index
    %c0_40 = arith.constant 0 : index
    %c0_41 = arith.constant 0 : index
    %91 = vector.load %arg7[%c0_39, %c0_40, %c0_41] : memref<1x8x128xf32, #tpu.memory_space<vmem>>, vector<1x8x128xf32>
    %92 = vector.shape_cast %91 : vector<1x8x128xf32> to vector<8x128xf32>
    %93 = vector.shape_cast %90 : vector<8x128xf32> to vector<1x8x128xf32>
    tpu.vector_store %arg7[%c0_39, %c0_40, %c0_41], %93 {strides = array<i32>} : memref<1x8x128xf32, #tpu.memory_space<vmem>>, vector<1x8x128xf32>,
    return
  }
  func.func @transform_0(%arg0: i32, %arg1: i32) -> (i32, i32, i32) {
    %c0_i32 = arith.constant 0 : i32
    %c0_i32_0 = arith.constant 0 : i32
    return %arg0, %arg1, %c0_i32 : i32, i32, i32
  }
  func.func @transform_1(%arg0: i32, %arg1: i32) -> (i32, i32, i32) {
    %c0_i32 = arith.constant 0 : i32
    %c0_i32_0 = arith.constant 0 : i32
    %c0_i32_1 = arith.constant 0 : i32
    return %arg0, %c0_i32, %c0_i32_0 : i32, i32, i32
  }
  func.func @transform_2(%arg0: i32, %arg1: i32) -> (i32, i32) {
    %c0_i32 = arith.constant 0 : i32
    %c0_i32_0 = arith.constant 0 : i32
    %c0_i32_1 = arith.constant 0 : i32
    return %c0_i32, %c0_i32_0 : i32, i32
  }
  func.func @transform_3(%arg0: i32, %arg1: i32) -> (i32, i32, i32) {
    %c0_i32 = arith.constant 0 : i32
    %c0_i32_0 = arith.constant 0 : i32
    %c0_i32_1 = arith.constant 0 : i32
    %c0_i32_2 = arith.constant 0 : i32
    return %c0_i32, %c0_i32_0, %c0_i32_1 : i32, i32, i32
  }
  func.func @transform_4(%arg0: i32, %arg1: i32) -> (i32, i32, i32) {
    %c0_i32 = arith.constant 0 : i32
    %c0_i32_0 = arith.constant 0 : i32
    %c0_i32_1 = arith.constant 0 : i32
    %c0_i32_2 = arith.constant 0 : i32
    return %c0_i32, %c0_i32_0, %c0_i32_1 : i32, i32, i32
  }
  func.func @transform_5(%arg0: i32, %arg1: i32) -> (i32, i32, i32) {
    %c0_i32 = arith.constant 0 : i32
    %c0_i32_0 = arith.constant 0 : i32
    %c0_i32_1 = arith.constant 0 : i32
    return %arg0, %c0_i32, %c0_i32_0 : i32, i32, i32
  }
}

</mosaic_0001>

<bundles_post_ra>
// kernel: wavlm_loss.1
= control target key start
LH: loop header
LB: loop body
LE: loop exit
PB: predicated region body
PF: predicated region fallthrough
CT: control target
= control target key end

     0   :  { %s1190_s18 = smov 0   ;;  %s1192_s19 = smov 0   ;;  %s1355_s0 = inlined_call_operand.vmem [shape: bf16[2,64,128], index: 0, kind: input, shape index: {}]   ;;  %s1356_s1 = inlined_call_operand.vmem [shape: bf16[2,128,128], index: 1, kind: input, shape index: {}]   ;;  %s1357_s2 = inlined_call_operand.vmem [shape: f32[1,128], index: 2, kind: input, shape index: {}]   ;;  %s1358_s3 = inlined_call_operand.vmem [shape: bf16[2,128,128], index: 3, kind: input, shape index: {}]   ;;  %s1359_s4 = inlined_call_operand.vmem [shape: f32[2,1,128], index: 4, kind: input, shape index: {}]   ;;  %s1360_s5 = inlined_call_operand.vmem [shape: f32[2,8,128], index: 5, kind: output, shape index: {}]  }
   0x1   :  { %s1194_s20 = smov 0   ;;  %s1196_s21 = smov 0  }
   0x2   :  { %s1198_s22 = smov 0  }
   0x3 LB: > { %s24_s23 = sadd.s32 1, %s1149_s20  ;;  %s27_s24 = sadd.s32 1, %s1153_s21  ;;  %s1157_s22 = sphi %s1198_s22, %s15_s22   ;;  %s1153_s21 = sphi %s1196_s21, %s1364_s21   ;;  %s1149_s20 = sphi %s1194_s20, %s1363_s20   ;;  %s1145_s19 = sphi %s1192_s19, %s1362_s19   ;;  %s1141_s18 = sphi %s1190_s18, %s1361_s18  }
   0x4   : > { %p25_p0 = scmp.ge.s32.totalorder %s24_s23, 2  ;;  %p881_p1 = scmp.ge.s32.totalorder %s1157_s22, 1 }
   0x5   : > { %p216_p2 = scmp.lt.s32.totalorder %s1157_s22, 5 }
   0x6   : > { %s1366_s23 = smov (%p25_p0, %s24_s23), 0  ;;  %s1368_s24 = smov (!%p25_p0, %s27_s24), %s1153_s21 }
   0x7   : > { %p217_p3 = pnand %p881_p1, %p216_p2  ;;  %p29_p4 = scmp.ge.s32.totalorder %s1368_s24, 2 }
   0x8   : > { %s882_s25 = sshll.u32 (!%p217_p3), %s1141_s18, 2  ;;  %p253_p5 = scmp.lt.s32.totalorder (!%p217_p3), %s1145_s19, 1 }
   0x9   : > { %s1370_s24 = smov (%p29_p4, %s1368_s24), 0  ;;  %220 = sbr.rel (%p217_p3) target bundleno = 772 (0x304), region = 40 }
   0xa   : > { %p255_p6 = scmp.lt.s32.totalorder (!%p217_p3), %s882_s25, 7  ;;  %p888_p7 = scmp.ne.s32.totalorder (!%p217_p3), %s1141_s18, 0 }
   0xe   : > { %s1372_s19 = smov (!%p253_p5, %s1145_s19), 1  ;;  %s1374_s25 = smov (!%p255_p6, %s882_s25), 7 }
   0xf   : > { %s883_s26 = sshll.u32 %s1372_s19, 3  ;;  %s937_s27 = sshll.u32 %s1372_s19, 6 }
  0x10   : > { %s258_s28 = sadd.s32 %s883_s26, %s1374_s25  ;;  %s1223_s6 = scalar_lea.vmem %s1356_s1, %s937_s27 }
  0x11   : > { %s884_s7 = sshll.u32 %s258_s28, 2  ;;  %s1228_s10 = scalar_lea.vmem %s1360_s5, %s883_s26 }
  0x12   : > { %s1233_s13 = scalar_lea.vmem %s1355_s0, %s884_s7  ;;  %275 = sbr.rel (%p888_p7) target bundleno = 25 (0x19), region = 44 }
  0x17   : > { %v1159_v0 = vmov 0.0  }
  0x18   : > { %276 = vst [vmem:[%s1228_s10] sm:$0xff] %v1159_v0 }
  0x19 PF: > { %v1069_v1 = vld [vmem:[%s1223_s6 + $0x38] sm:$0xff]   ;;  %v1070_v2 = vld [vmem:[%s1223_s6 + $0x30] sm:$0xff]   ;;  %v1071_v3 = vld [vmem:[%s1223_s6 + $0x28] sm:$0xff]  }
  0x1a   : > { %968 = vmatprep.subr.bf16.mxu0 %v1069_v1  ;;  %v1072_v4 = vld [vmem:[%s1223_s6 + $0x20] sm:$0xff]   ;;  %v1073_v6 = vld [vmem:[%s1223_s6 + $0x18] sm:$0xff]   ;;  %v1074_v7 = vld [vmem:[%s1223_s6 + $0x10] sm:$0xff]  }
  0x1b   : > { %969 = vmatpush3.bf16.msra.mxu0 %v1069_v1  ;;  %v1077_v5 = vld [vmem:[%s1233_s13] sm:$0xff]   ;;  %v1075_v8 = vld [vmem:[%s1223_s6 + $0x8] sm:$0xff]   ;;  %v1079_v11 = vld [vmem:[%s1358_s3 + $0x38] sm:$0xff]  }
  0x1c   : > { %970 = vmatprep.subr.bf16.mxu0 %v1070_v2  ;;  %984 = vmatprep.mubr.bf16.mxu0 %v1077_v5  ;;  %v1076_v9 = vld [vmem:[%s1223_s6] sm:$0xff]   ;;  %v1078_v10 = vld [vmem:[%s1233_s13 + $0x8] sm:$0xff]   ;;  %v1080_v12 = vld [vmem:[%s1358_s3 + $0x30] sm:$0xff]  }
  0x1d   : > { %988 = vmatprep.subr.bf16.mxu1 %v1079_v11  ;;  %v1081_v13 = vld [vmem:[%s1358_s3 + $0x28] sm:$0xff]   ;;  %v1082_v14 = vld [vmem:[%s1358_s3 + $0x20] sm:$0xff]   ;;  %v1083_v15 = vld [vmem:[%s1358_s3 + $0x18] sm:$0xff]  }
  0x1e   : > { %989 = vmatpush3.bf16.msra.mxu1 %v1079_v11  ;;  %v1084_v16 = vld [vmem:[%s1358_s3 + $0x10] sm:$0xff]   ;;  %v1085_v17 = vld [vmem:[%s1358_s3 + $0x8] sm:$0xff]   ;;  %v1086_v18 = vld [vmem:[%s1358_s3] sm:$0xff]  }
  0x1f   : > { %971 = vmatpush3.bf16.msra.mxu0 %v1070_v2  ;;  %990 = vmatprep.subr.bf16.mxu1 %v1080_v12  ;;  %v889_v19 = vld [vmem:[%s1357_s2] ss:$0 sm:$0xff]  ;;  %v1087_v2 = vld [vmem:[%s1358_s3 + $0x78] sm:$0xff]  }
  0x20   : > { %972 = vmatprep.subr.bf16.mxu0 %v1071_v3  ;;  %v1090_v5 = vld [vmem:[%s1358_s3 + $0x60] sm:$0xff]  }
  0x22   : > { %991 = vmatpush3.bf16.msra.mxu1 %v1080_v12 }
  0x23   : > { %973 = vmatpush3.bf16.msra.mxu0 %v1071_v3  ;;  %992 = vmatprep.subr.bf16.mxu1 %v1081_v13  ;;  %v1088_v3 = vld [vmem:[%s1358_s3 + $0x70] sm:$0xff]  }
  0x24   : > { %974 = vmatprep.subr.bf16.mxu0 %v1072_v4 }
  0x26   : > { %993 = vmatpush3.bf16.msra.mxu1 %v1081_v13 }
  0x27   : > { %975 = vmatpush3.bf16.msra.mxu0 %v1072_v4  ;;  %994 = vmatprep.subr.bf16.mxu1 %v1082_v14  ;;  %v1089_v4 = vld [vmem:[%s1358_s3 + $0x68] sm:$0xff]  }
  0x28   : > { %976 = vmatprep.subr.bf16.mxu0 %v1073_v6 }
  0x2a   : > { %995 = vmatpush3.bf16.msra.mxu1 %v1082_v14 }
  0x2b   : > { %977 = vmatpush3.bf16.msra.mxu0 %v1073_v6  ;;  %996 = vmatprep.subr.bf16.mxu1 %v1083_v15  ;;  %v1091_v6 = vld [vmem:[%s1358_s3 + $0x58] sm:$0xff]  }
  0x2c   : > { %978 = vmatprep.subr.bf16.mxu0 %v1074_v7 }
  0x2e   : > { %997 = vmatpush3.bf16.msra.mxu1 %v1083_v15 }
  0x2f   : > { %979 = vmatpush3.bf16.msra.mxu0 %v1074_v7  ;;  %998 = vmatprep.subr.bf16.mxu1 %v1084_v16  ;;  %v1092_v7 = vld [vmem:[%s1358_s3 + $0x50] sm:$0xff]  }
  0x30   : > { %980 = vmatprep.subr.bf16.mxu0 %v1075_v8 }
  0x32   : > { %999 = vmatpush3.bf16.msra.mxu1 %v1084_v16 }
  0x33   : > { %981 = vmatpush3.bf16.msra.mxu0 %v1075_v8  ;;  %1000 = vmatprep.subr.bf16.mxu1 %v1085_v17  ;;  %v1093_v8 = vld [vmem:[%s1358_s3 + $0x48] sm:$0xff]  }
  0x34   : > { %982 = vmatprep.subr.bf16.mxu0 %v1076_v9 }
  0x36   : > { %1001 = vmatpush3.bf16.msra.mxu1 %v1085_v17 }
  0x37   : > { %983 = vmatpush3.bf16.msra.mxu0 %v1076_v9  ;;  %1002 = vmatprep.subr.bf16.mxu1 %v1086_v18  ;;  %v1094_v9 = vld [vmem:[%s1358_s3 + $0x40] sm:$0xff]  }
  0x38   : > { %1008 = vmatprep.subr.bf16.mxu0 %v1087_v2 }
  0x3a   : > { %985 = vmatmul.mubr.bf16.vlgmr.msra.gmra.mxu0 %v1078_v10  ;;  %1003 = vmatpush3.bf16.msra.mxu1 %v1086_v18  ;;  %v900_v10 = vld [vmem:[%s1359_s4] ss:$0 sm:$0xff] }
  0x3b   : > { %1009 = vmatpush3.bf16.msra.mxu0 %v1087_v2 }
  0x3c   : > { %1010 = vmatprep.subr.bf16.mxu0 %v1088_v3 }
  0x3f   : > { %1011 = vmatpush3.bf16.msra.mxu0 %v1088_v3 }
  0x40   : > { %1012 = vmatprep.subr.bf16.mxu0 %v1089_v4 }
  0x43   : > { %1013 = vmatpush3.bf16.msra.mxu0 %v1089_v4 }
  0x44   : > { %1014 = vmatprep.subr.bf16.mxu0 %v1090_v5 }
  0x47   : > { %1015 = vmatpush3.bf16.msra.mxu0 %v1090_v5 }
  0x48   : > { %1016 = vmatprep.subr.bf16.mxu0 %v1091_v6 }
  0x4b   : > { %1017 = vmatpush3.bf16.msra.mxu0 %v1091_v6 }
  0x4c   : > { %1018 = vmatprep.subr.bf16.mxu0 %v1092_v7 }
  0x4f   : > { %1019 = vmatpush3.bf16.msra.mxu0 %v1092_v7 }
  0x50   : > { %1020 = vmatprep.subr.bf16.mxu0 %v1093_v8 }
  0x53   : > { %1021 = vmatpush3.bf16.msra.mxu0 %v1093_v8 }
  0x54   : > { %1022 = vmatprep.subr.bf16.mxu0 %v1094_v9 }
  0x57   : > { %1023 = vmatpush3.bf16.msra.mxu0 %v1094_v9 }
  0xfa   : > { %v986_v20 = vpop.f32.mrf.mxu0 }
  0xfb   : > { %v407_v21 = vadd.f32 %v986_v20, %v889_v19 }
  0xfc   : > { %v398_v22 = vpop.f32.mrf.mxu0 }
  0xfd   : > { %v415_v23 = vmul.f32 %v407_v21, %v407_v21  ;;  %v399_v24 = vadd.f32 %v889_v19, %v398_v22 }
  0xfe   : > { %v987_v25 = vpop.f32.mrf.mxu0 }
  0xff   : > { %v419_v26 = vmul.f32 %v415_v23, %v407_v21  ;;  %v413_v27 = vmul.f32 %v399_v24, %v399_v24  ;;  %v410_v28 = vadd.f32 %v987_v25, %v889_v19 }
 0x100   : > { %v401_v29 = vpop.f32.mrf.mxu0 }
 0x101   : > { %v423_v30 = vmul.f32 0.044715, %v419_v26  ;;  %v417_v31 = vmul.f32 %v413_v27, %v399_v24  ;;  %v416_v32 = vmul.f32 %v410_v28, %v410_v28  ;;  %v402_v33 = vadd.f32 %v889_v19, %v401_v29 }
 0x103   : > { %v427_v34 = vadd.f32 %v423_v30, %v407_v21  ;;  %v421_v35 = vmul.f32 0.044715, %v417_v31  ;;  %v420_v36 = vmul.f32 %v416_v32, %v410_v28  ;;  %v414_v37 = vmul.f32 %v402_v33, %v402_v33 }
 0x105   : > { %v431_v38 = vmul.f32 0.7978846, %v427_v34  ;;  %v425_v39 = vadd.f32 %v421_v35, %v399_v24  ;;  %v424_v40 = vmul.f32 0.044715, %v420_v36  ;;  %v418_v41 = vmul.f32 %v414_v37, %v402_v33 }
 0x107   : > { %v429_v42 = vmul.f32 0.7978846, %v425_v39  ;;  %v428_v43 = vadd.f32 %v424_v40, %v410_v28  ;;  %v422_v44 = vmul.f32 0.044715, %v418_v41  ;;  %1095 = vtanh.f32 %v431_v38 }
 0x109   : > { %1097 = vtanh.f32 %v429_v42  ;;  %v432_v45 = vmul.f32 0.7978846, %v428_v43  ;;  %v426_v46 = vadd.f32 %v422_v44, %v402_v33 }
 0x10b   : > { %1099 = vtanh.f32 %v432_v45  ;;  %v430_v47 = vmul.f32 0.7978846, %v426_v46 }
 0x10d   : > { %1101 = vtanh.f32 %v430_v47 }
 0x114   : > { %v1096_v48 = vpop.eup %1095 }
 0x115   : > { %v439_v52 = vadd.f32 1.0, %v1096_v48 }
 0x116   : > { %v1098_v49 = vpop.eup %1097 }
 0x117   : > { %v437_v50 = vadd.f32 1.0, %v1098_v49  ;;  %v443_v58 = vmul.f32 0.5, %v439_v52 }
 0x118   : > { %v1100_v51 = vpop.eup %1099 }
 0x119   : > { %v440_v53 = vadd.f32 1.0, %v1100_v51  ;;  %v441_v56 = vmul.f32 0.5, %v437_v50  ;;  %v1279_v63 = vmul.f32 %v443_v58, %v407_v21 }
 0x11a   : > { %v1102_v54 = vpop.eup %1101 }
 0x11b   : > { %v438_v55 = vadd.f32 1.0, %v1102_v54  ;;  %v444_v57 = vmul.f32 0.5, %v440_v53  ;;  %v1275_v61 = vmul.f32 %v441_v56, %v399_v24 }
 0x11d   : > { %v442_v59 = vmul.f32 0.5, %v438_v55  ;;  %v1273_v60 = vmul.f32 %v444_v57, %v410_v28 }
 0x11f   : > { %v1277_v62 = vmul.f32 %v442_v59, %v402_v33  ;;  %v472_v1 = vpack.c.bf16 %v1273_v60, %v1279_v63 }
 0x121   : > { %v471_v0 = vpack.c.bf16 %v1277_v62, %v1275_v61 }
 0x123   : > { %1004 = vmatprep.mubr.bf16.mxu1 %v471_v0 }
 0x124   : > { %1005 = vmatmul.mubr.bf16.vlgmr.msra.gmra.mxu1 %v472_v1  ;;  %v926_v1 = vld [vmem:[%s1359_s4 + $0x1] ss:$0 sm:$0xff] }
 0x1e4   : > { %v1006_v11 = vpop.f32.mrf.mxu1 }
 0x1e5   : > { %v570_v12 = vadd.f32 %v1006_v11, %v900_v10 }
 0x1e6   : > { %v561_v13 = vpop.f32.mrf.mxu1 }
 0x1e7   : > { %v578_v14 = vmul.f32 %v570_v12, %v570_v12  ;;  %v562_v15 = vadd.f32 %v900_v10, %v561_v13 }
 0x1e8   : > { %v1007_v16 = vpop.f32.mrf.mxu1 }
 0x1e9   : > { %v582_v17 = vmul.f32 %v578_v14, %v570_v12  ;;  %v576_v18 = vmul.f32 %v562_v15, %v562_v15  ;;  %v573_v19 = vadd.f32 %v1007_v16, %v900_v10 }
 0x1ea   : > { %v564_v20 = vpop.f32.mrf.mxu1 }
 0x1eb   : > { %v586_v21 = vmul.f32 0.044715, %v582_v17  ;;  %v580_v22 = vmul.f32 %v576_v18, %v562_v15  ;;  %v579_v23 = vmul.f32 %v573_v19, %v573_v19  ;;  %v565_v24 = vadd.f32 %v900_v10, %v564_v20 }
 0x1ed   : > { %v590_v25 = vadd.f32 %v586_v21, %v570_v12  ;;  %v584_v26 = vmul.f32 0.044715, %v580_v22  ;;  %v583_v27 = vmul.f32 %v579_v23, %v573_v19  ;;  %v577_v28 = vmul.f32 %v565_v24, %v565_v24 }
 0x1ef   : > { %v594_v29 = vmul.f32 0.7978846, %v590_v25  ;;  %v588_v30 = vadd.f32 %v584_v26, %v562_v15  ;;  %v587_v31 = vmul.f32 0.044715, %v583_v27  ;;  %v581_v32 = vmul.f32 %v577_v28, %v565_v24 }
 0x1f1   : > { %1103 = vtanh.f32 %v594_v29  ;;  %v592_v33 = vmul.f32 0.7978846, %v588_v30  ;;  %v591_v34 = vadd.f32 %v587_v31, %v573_v19  ;;  %v585_v35 = vmul.f32 0.044715, %v581_v32 }
 0x1f3   : > { %1105 = vtanh.f32 %v592_v33  ;;  %v595_v36 = vmul.f32 0.7978846, %v591_v34  ;;  %v589_v37 = vadd.f32 %v585_v35, %v565_v24 }
 0x1f5   : > { %1107 = vtanh.f32 %v595_v36  ;;  %v593_v38 = vmul.f32 0.7978846, %v589_v37 }
 0x1f7   : > { %1109 = vtanh.f32 %v593_v38 }
 0x1fe   : > { %v1104_v39 = vpop.eup %1103 }
 0x1ff   : > { %v602_v41 = vadd.f32 1.0, %v1104_v39 }
 0x200   : > { %v1106_v40 = vpop.eup %1105 }
 0x201   : > { %v600_v42 = vadd.f32 1.0, %v1106_v40  ;;  %v606_v47 = vmul.f32 0.5, %v602_v41 }
 0x202   : > { %v1108_v43 = vpop.eup %1107 }
 0x203   : > { %v604_v44 = vmul.f32 0.5, %v600_v42  ;;  %v603_v45 = vadd.f32 1.0, %v1108_v43  ;;  %v610_v53 = vmul.f32 %v606_v47, %v570_v12 }
 0x204   : > { %v1110_v46 = vpop.eup %1109 }
 0x205   : > { %v607_v48 = vmul.f32 0.5, %v603_v45  ;;  %v601_v49 = vadd.f32 1.0, %v1110_v46  ;;  %v608_v50 = vmul.f32 %v604_v44, %v562_v15  ;;  %v614_v58 = vadd.f32 %v610_v53, %v1279_v63 }
 0x206   : > { %v450_v44 = vsub.f32 %v1277_v62, %v1273_v60 }
 0x207   : > { %v611_v51 = vmul.f32 %v607_v48, %v573_v19  ;;  %v605_v52 = vmul.f32 0.5, %v601_v49  ;;  %v1316_v56 = vadd.f32 %v608_v50, %v1275_v61  ;;  %v449_v49 = vsub.f32 %v1275_v61, %v1279_v63  ;;  %v792_v63 = vld [vmem:[%s1228_s10] sm:$0xff] }
 0x208   : > { %v452_v53 = vand.u32 2147483647, %v450_v44 }
 0x209   : > { %v609_v54 = vmul.f32 %v605_v52, %v565_v24  ;;  %v1313_v55 = vadd.f32 %v611_v51, %v1273_v60  ;;  %v616_v45 = vsub.f32 %v1316_v56, %v614_v58 }
 0x20b   : > { %v1319_v57 = vadd.f32 %v609_v54, %v1277_v62  ;;  %v642_v0 = vpack.c.bf16 %v1313_v55, %v614_v58  ;;  %v618_v54 = vand.u32 2147483647, %v616_v45  ;;  %v451_v62 = vand.u32 2147483647, %v449_v49 }
 0x20d   : > { %v641_v59 = vpack.c.bf16 %v1319_v57, %v1316_v56  ;;  %v617_v39 = vsub.f32 %v1319_v57, %v1313_v55 }
 0x20f   : > { %1024 = vmatprep.mubr.bf16.mxu0 %v641_v59  ;;  %v619_v50 = vand.u32 2147483647, %v617_v39 }
 0x210   : > { %1025 = vmatmul.mubr.bf16.vlgmr.msra.gmra.mxu0 %v642_v0 }
 0x2d0   : > { %v1026_v2 = vpop.f32.mrf.mxu0 }
 0x2d1   : > { %v740_v3 = vadd.f32 %v1026_v2, %v926_v1  ;;  %v453_v2 = vadd.f32 %v452_v53, %v451_v62 }
 0x2d2   : > { %v731_v4 = vpop.f32.mrf.mxu0 }
 0x2d3   : > { %v748_v5 = vmul.f32 %v740_v3, %v740_v3  ;;  %v732_v6 = vadd.f32 %v926_v1, %v731_v4 }
 0x2d4   : > { %v1027_v7 = vpop.f32.mrf.mxu0 }
 0x2d5   : > { %v752_v8 = vmul.f32 %v748_v5, %v740_v3  ;;  %v746_v9 = vmul.f32 %v732_v6, %v732_v6  ;;  %v743_v10 = vadd.f32 %v1027_v7, %v926_v1 }
 0x2d6   : > { %v734_v11 = vpop.f32.mrf.mxu0 }
 0x2d7   : > { %v756_v12 = vmul.f32 0.044715, %v752_v8  ;;  %v750_v13 = vmul.f32 %v746_v9, %v732_v6  ;;  %v749_v14 = vmul.f32 %v743_v10, %v743_v10  ;;  %v735_v15 = vadd.f32 %v926_v1, %v734_v11 }
 0x2d8   : > { %v620_v1 = vadd.f32 %v619_v50, %v618_v54 }
 0x2d9   : > { %v760_v16 = vadd.f32 %v756_v12, %v740_v3  ;;  %v754_v17 = vmul.f32 0.044715, %v750_v13  ;;  %v753_v18 = vmul.f32 %v749_v14, %v743_v10  ;;  %v747_v19 = vmul.f32 %v735_v15, %v735_v15 }
 0x2da   : > { %v621_v5 = vadd.f32 %v620_v1, %v453_v2 }
 0x2db   : > { %v764_v20 = vmul.f32 0.7978846, %v760_v16  ;;  %v758_v21 = vadd.f32 %v754_v17, %v732_v6  ;;  %v757_v22 = vmul.f32 0.044715, %v753_v18  ;;  %v751_v23 = vmul.f32 %v747_v19, %v735_v15 }
 0x2dd   : > { %1111 = vtanh.f32 %v764_v20  ;;  %v762_v24 = vmul.f32 0.7978846, %v758_v21  ;;  %v761_v25 = vadd.f32 %v757_v22, %v743_v10  ;;  %v755_v26 = vmul.f32 0.044715, %v751_v23 }
 0x2df   : > { %1113 = vtanh.f32 %v762_v24  ;;  %v765_v27 = vmul.f32 0.7978846, %v761_v25  ;;  %v759_v28 = vadd.f32 %v755_v26, %v735_v15 }
 0x2e1   : > { %1115 = vtanh.f32 %v765_v27  ;;  %v763_v29 = vmul.f32 0.7978846, %v759_v28 }
 0x2e3   : > { %1117 = vtanh.f32 %v763_v29 }
 0x2ea   : > { %v1112_v30 = vpop.eup %1111 }
 0x2eb   : > { %v772_v31 = vadd.f32 1.0, %v1112_v30 }
 0x2ec   : > { %v1114_v32 = vpop.eup %1113 }
 0x2ed   : > { %v776_v33 = vmul.f32 0.5, %v772_v31  ;;  %v770_v34 = vadd.f32 1.0, %v1114_v32 }
 0x2ee   : > { %v1116_v35 = vpop.eup %1115 }
 0x2ef   : > { %v774_v36 = vmul.f32 0.5, %v770_v34  ;;  %v773_v37 = vadd.f32 1.0, %v1116_v35  ;;  %v780_v40 = vmul.f32 %v776_v33, %v740_v3 }
 0x2f0   : > { %v1118_v38 = vpop.eup %1117 }
 0x2f1   : > { %v778_v41 = vmul.f32 %v774_v36, %v732_v6  ;;  %v777_v42 = vmul.f32 0.5, %v773_v37  ;;  %v771_v43 = vadd.f32 1.0, %v1118_v38  ;;  %v784_v51 = vadd.f32 %v780_v40, %v614_v58 }
 0x2f3   : > { %v782_v46 = vadd.f32 %v778_v41, %v1316_v56  ;;  %v781_v47 = vmul.f32 %v777_v42, %v743_v10  ;;  %v775_v48 = vmul.f32 0.5, %v771_v43 }
 0x2f5   : > { %v779_v52 = vmul.f32 %v775_v48, %v735_v15  ;;  %v786_v59 = vsub.f32 %v782_v46, %v784_v51  ;;  %v785_v0 = vadd.f32 %v781_v47, %v1313_v55 }
 0x2f7   : > { %v783_v60 = vadd.f32 %v779_v52, %v1319_v57  ;;  %v788_v3 = vand.u32 2147483647, %v786_v59 }
 0x2f9   : > { %v787_v56 = vsub.f32 %v783_v60, %v785_v0 }
 0x2fb   : > { %v789_v4 = vand.u32 2147483647, %v787_v56 }
 0x2fd   : > { %v790_v61 = vadd.f32 %v789_v4, %v788_v3 }
 0x2ff   : > { %v791_v6 = vadd.f32 %v790_v61, %v621_v5 }
 0x301   : > { %v793_v58 = vadd.f32 %v792_v63, %v791_v6 }
 0x303   : > { %794 = vst [vmem:[%s1228_s10] sm:$0xff] %v793_v58 }
 0x304 PF: > { %s15_s22 = sadd.s32 1, %s1157_s22   ;;  %s1361_s18 = smov %s1149_s20 }
 0x305   : > { %p12_p8 = scmp.ge.s32.totalorder %s15_s22, 6   ;;  %s1362_s19 = smov %s1153_s21 }
 0x306   : > { %s1363_s20 = smov %s1366_s23  ;;  %s1364_s21 = smov %s1370_s24 }
 0x307   :  { %14 = sbr.rel (!%p12_p8) target bundleno = 3 (0x3), region = 79 }

</bundles_post_ra>
